<compile_context>
chip_gen: v5e
topology: v5e:2x2
jax: 0.10.0
libtpu: 0.0.40
codegen_flags: <defaults>
</compile_context>

<pallas_src>
import functools

import jax
import jax.numpy as jnp
from jax import lax
from jax.experimental import pallas as pl
from jax.experimental.pallas import tpu as pltpu

GAMMA = 10.0


def _make_snm_kernel(num_branches, n_items, tn, tiles_per_split):
    """Builds the kernel for fixed static shapes (closes over Python scalars only)."""
    pairs = [(i, j) for i in range(num_branches) for j in range(i + 1, num_branches)]

    def kernel(x_ref, snm_ref):
        # x_ref  : (B, F, TN) tile -- items on the lane axis, features on sublanes.
        # snm_ref: (1, B, B) partial accumulator, resident across the tile axis.
        c = pl.program_id(0)          # split of the item axis (v7x megacore)
        n = pl.program_id(1)          # item-tile index within this split

        @pl.when(n == 0)
        def _():
            snm_ref[...] = jnp.zeros_like(snm_ref)

        # Ragged-tail validity mask over the lane (item) axis.
        blk = c * tiles_per_split + n
        item = blk * tn + lax.broadcasted_iota(jnp.int32, (1, tn), 1)
        valid = item < n_items

        # Hoisted per-branch load + cast (each branch read/cast once per step,
        # reused for every pair).
        xb = [x_ref[i].astype(jnp.float32) for i in range(num_branches)]

        pair_sums = []
        for (i, j) in pairs:
            d = xb[i] - xb[j]                                   # (F, TN) on the VPU
            sq = jnp.sum(d * d, axis=0, keepdims=True)          # (1, TN) sublane reduce
            e = jnp.where(valid, jnp.exp(-GAMMA * sq), 0.0)     # lane-dense exp + mask
            pair_sums.append(jnp.sum(e))                        # scalar partial sum

        # Scatter the pair scalars into the (B, B) accumulator with in-kernel
        # iota masks (no captured array constants; B is tiny so this is one vreg).
        row = lax.broadcasted_iota(jnp.int32, (1, num_branches, num_branches), 1)
        col = lax.broadcasted_iota(jnp.int32, (1, num_branches, num_branches), 2)
        upd = jnp.zeros((1, num_branches, num_branches), jnp.float32)
        for (i, j), s in zip(pairs, pair_sums):
            m = ((row == i) & (col == j)) | ((row == j) & (col == i))
            upd = upd + jnp.where(m, s, 0.0)
        snm_ref[...] += upd

    return kernel


def _snm_pallas(xt):
    """xt: (B, F, N) items-on-lanes layout -> partial exp-sums (n_splits, B, B) f32."""
    b, f, n_items = xt.shape
    isz = jnp.dtype(xt.dtype).itemsize

    # Per-item VMEM cost: double-buffered input column, B hoisted f32 branch
    # copies, and a few f32 pair temporaries (d, d*d, partials).
    bytes_per_item = f * (2 * b * isz + 4 * b + 4 * 4)
    budget = 12 * 1024 * 1024          # comfortably inside v5e/v6e/v7x scoped VMEM
    tn = budget // max(1, bytes_per_item)
    if tn >= n_items:
        tn = n_items                   # single full tile (full-dim block, any size OK)
    else:
        tn = max(128, (tn // 128) * 128)   # lane-aligned item tiles

    n_tiles = -(-n_items // tn)
    # 2-way split of the item axis for v7x's two TensorCores -- only when it is
    # free on single-TC chips (even tile count => no phantom tiles, no extra DMA).
    n_splits = 2 if (n_tiles >= 2 and n_tiles % 2 == 0) else 1
    tiles_per_split = n_tiles // n_splits
    assert n_splits * tiles_per_split == n_tiles

    kernel = _make_snm_kernel(b, n_items, tn, tiles_per_split)

    vmem_limit = int(min(48 * 1024 * 1024,
                         max(16 * 1024 * 1024, 2 * bytes_per_item * tn)))

    return pl.pallas_call(
        kernel,
        out_shape=jax.ShapeDtypeStruct((n_splits, b, b), jnp.float32),
        grid_spec=pltpu.PrefetchScalarGridSpec(
            num_scalar_prefetch=0,
            grid=(n_splits, tiles_per_split),
            in_specs=[pl.BlockSpec(
                (b, f, tn),
                lambda c, n: (0, 0, c * tiles_per_split + n))],
            out_specs=pl.BlockSpec((1, b, b), lambda c, n: (c, 0, 0)),
        ),
        compiler_params=pltpu.CompilerParams(
            # TODO(synk): on v7x, confirm in an xprof trace that the leading axis
            # shards across the two TensorCores; if not, switch it to
            # pltpu.CORE_PARALLEL / pl.core_map.
            dimension_semantics=("parallel", "arbitrary"),
            vmem_limit_bytes=vmem_limit,
        ),
    )(xt)


@functools.partial(jax.jit, static_argnames=("type",))
def branch_diversity(x, type="spatial"):
    num_branches = x.shape[0]
    n_items = x.shape[1]

    if type == "spatial":
        xr = x.reshape(num_branches, n_items, -1)   # (B, N, H*W)
    elif type == "channel":
        xr = x                                      # (B, N, C)
    else:
        raise ValueError(f"unknown type: {type}")

    # Items-on-lanes layout for the kernel: (B, F, N).  One extra HBM pass in
    # the wrapper, paid back by lane-dense exp/reduce inside the kernel.
    xt = jnp.transpose(xr, (0, 2, 1))
    # TODO(synk): optionally cast xt to bf16 here to halve HBM traffic (numerics tradeoff).

    partials = _snm_pallas(xt)                      # (n_splits, B, B) sums of exp terms
    snm = jnp.sum(partials, axis=0) / jnp.float32(n_items)

    # TODO(synk): det/logdet of the tiny (B, B) matrix use jnp.linalg (LU) -- no clean
    # Pallas equivalent; this matches torch.det / torch.logdet semantics.
    direct_div = jnp.sum(snm)
    det_div = -jnp.linalg.det(snm)
    sign, logabs = jnp.linalg.slogdet(snm)
    logdet = jnp.where(sign > 0, logabs, jnp.where(sign == 0, -jnp.inf, jnp.nan))
    logdet_div = -logdet

    return {
        "snm": snm,
        "direct_div": direct_div,
        "det_div": det_div,
        "logdet_div": logdet_div,
    }


def _reference_snm(x, type="spatial"):
    """Plain-JAX replica of the exact PyTorch loop, for correctness checking."""
    x = x.astype(jnp.float32)
    b = x.shape[0]
    xf = x.reshape(b, x.shape[1], -1) if type == "spatial" else x
    d = xf[:, None] - xf[None, :]                    # (B, B, N, F)
    s = jnp.sum(d * d, axis=-1)                      # (B, B, N)
    vals = jnp.mean(jnp.exp(-GAMMA * s), axis=-1)    # (B, B)
    return jnp.where(jnp.eye(b, dtype=bool), 0.0, vals)


if __name__ == "__main__":
    root = jax.random.PRNGKey(0)
    k0, k1, k2 = jax.random.split(root, 3)

    # spatial: x has shape (num_branches, N, H, W)
    B, N, H, W = 3, 4, 16, 16
    x = jax.random.normal(k0, (B, N, H, W), dtype=jnp.float32) * 0.02
    out = branch_diversity(x, type="spatial")
    jax.block_until_ready(out)
    ref = _reference_snm(x, "spatial")
    assert jnp.allclose(out["snm"], ref, rtol=2e-4, atol=1e-5), (out["snm"], ref)
    assert jnp.allclose(out["direct_div"], jnp.sum(ref), rtol=2e-4, atol=1e-5)

    # channel: x has shape (num_branches, N, C)
    C = 32
    xc = jax.random.normal(k1, (B, N, C), dtype=jnp.float32) * 0.05
    outc = branch_diversity(xc, type="channel")
    jax.block_until_ready(outc)
    refc = _reference_snm(xc, "channel")
    assert jnp.allclose(outc["snm"], refc, rtol=2e-4, atol=1e-5), (outc["snm"], refc)

    # larger N: exercises the multi-tile path, the ragged-tail mask and the
    # even-tile-count 2-way split.
    B2, N2, H2, W2 = 3, 1200, 16, 16
    xl = jax.random.normal(k2, (B2, N2, H2, W2), dtype=jnp.float32) * 0.03
    outl = branch_diversity(xl, type="spatial")
    jax.block_until_ready(outl)
    refl = _reference_snm(xl, "spatial")
    assert jnp.allclose(outl["snm"], refl, rtol=2e-4, atol=1e-5), (outl["snm"], refl)

    print("KERNEL_OK")
</pallas_src>

<mosaic_0001>
module attributes {stable_mosaic.version = 11 : i64} {
  func.func @kernel(%arg0: i32, %arg1: i32, %arg2: memref<3x256x4xf32, #tpu.memory_space<vmem>>, %arg3: memref<1x3x3xf32, #tpu.memory_space<vmem>>) attributes {dimension_semantics = [#tpu.dimension_semantics<parallel>, #tpu.dimension_semantics<arbitrary>], iteration_bounds = array<i64: 1, 1>, scalar_prefetch = 0 : i64, scratch_operands = 0 : i64, tpu.core_type = #tpu.core_type<tc>, window_params = [{transform_indices = @transform_0, window_bounds = array<i64: 3, 256, 4>}, {transform_indices = @transform_1, window_bounds = array<i64: 1, 3, 3>}]} {
    %c0_i32 = arith.constant 0 : i32
    %0 = arith.cmpi eq, %arg1, %c0_i32 : i32
    %1 = arith.extui %0 : i1 to i32
    %c0_i32_0 = arith.constant 0 : i32
    %2 = arith.cmpi ne, %1, %c0_i32_0 : i32
    scf.if %2 {
      %cst_40 = arith.constant 0.000000e+00 : f32
      %107 = vector.broadcast %cst_40 : f32 to vector<1x3x3xf32>
      %c0_41 = arith.constant 0 : index
      %c0_42 = arith.constant 0 : index
      %c0_43 = arith.constant 0 : index
      %108 = vector.load %arg3[%c0_41, %c0_42, %c0_43] : memref<1x3x3xf32, #tpu.memory_space<vmem>>, vector<1x3x3xf32>
      tpu.vector_store %arg3[%c0_41, %c0_42, %c0_43], %107 {strides = array<i32>} : memref<1x3x3xf32, #tpu.memory_space<vmem>>, vector<1x3x3xf32>,
    } else {
    }
    %c1_i32 = arith.constant 1 : i32
    %3 = arith.muli %arg0, %c1_i32 : i32
    %4 = arith.addi %3, %arg1 : i32
    %c4_i32 = arith.constant 4 : i32
    %5 = arith.muli %4, %c4_i32 : i32
    %6 = tpu.iota {dimensions = array<i32: 1>} : vector<1x4xi32>
    %7 = vector.broadcast %5 : i32 to vector<1x4xi32>
    %8 = arith.addi %7, %6 : vector<1x4xi32>
    %c4_i32_1 = arith.constant 4 : i32
    %9 = vector.broadcast %c4_i32_1 : i32 to vector<1x4xi32>
    %10 = arith.cmpi slt, %8, %9 : vector<1x4xi32>
    %c0 = arith.constant 0 : index
    %c0_2 = arith.constant 0 : index
    %c0_3 = arith.constant 0 : index
    %11 = vector.load %arg2[%c0, %c0_2, %c0_3] : memref<3x256x4xf32, #tpu.memory_space<vmem>>, vector<1x256x4xf32>
    %12 = vector.shape_cast %11 : vector<1x256x4xf32> to vector<256x4xf32>
    %c1 = arith.constant 1 : index
    %c0_4 = arith.constant 0 : index
    %c0_5 = arith.constant 0 : index
    %13 = vector.load %arg2[%c1, %c0_4, %c0_5] : memref<3x256x4xf32, #tpu.memory_space<vmem>>, vector<1x256x4xf32>
    %14 = vector.shape_cast %13 : vector<1x256x4xf32> to vector<256x4xf32>
    %c2 = arith.constant 2 : index
    %c0_6 = arith.constant 0 : index
    %c0_7 = arith.constant 0 : index
    %15 = vector.load %arg2[%c2, %c0_6, %c0_7] : memref<3x256x4xf32, #tpu.memory_space<vmem>>, vector<1x256x4xf32>
    %16 = vector.shape_cast %15 : vector<1x256x4xf32> to vector<256x4xf32>
    %17 = arith.subf %12, %14 : vector<256x4xf32>
    %18 = arith.mulf %17, %17 : vector<256x4xf32>
    %cst = arith.constant dense<0.000000e+00> : vector<4xf32>
    %19 = vector.multi_reduction <add>, %18, %cst [0] : vector<256x4xf32> to vector<4xf32>
    %20 = vector.shape_cast %19 : vector<4xf32> to vector<1x4xf32>
    %cst_8 = arith.constant -1.000000e+01 : f32
    %21 = vector.broadcast %cst_8 : f32 to vector<1x4xf32>
    %22 = arith.mulf %21, %20 : vector<1x4xf32>
    %23 = math.exp %22 : vector<1x4xf32>
    %cst_9 = arith.constant 0.000000e+00 : f32
    %24 = vector.broadcast %cst_9 : f32 to vector<1x4xf32>
    %25 = arith.select %10, %23, %24 : vector<1x4xi1>, vector<1x4xf32>
    %26 = vector.shape_cast %25 : vector<1x4xf32> to vector<1x1x4xf32>
    %cst_10 = arith.constant dense<0.000000e+00> : vector<1xf32>
    %27 = vector.multi_reduction <add>, %26, %cst_10 [1, 2] : vector<1x1x4xf32> to vector<1xf32>
    %28 = vector.shape_cast %27 : vector<1xf32> to vector<1x1x1xf32>
    %29 = vector.extract %28[0, 0, 0] : f32 from vector<1x1x1xf32>
    %30 = arith.subf %12, %16 : vector<256x4xf32>
    %31 = arith.mulf %30, %30 : vector<256x4xf32>
    %cst_11 = arith.constant dense<0.000000e+00> : vector<4xf32>
    %32 = vector.multi_reduction <add>, %31, %cst_11 [0] : vector<256x4xf32> to vector<4xf32>
    %33 = vector.shape_cast %32 : vector<4xf32> to vector<1x4xf32>
    %cst_12 = arith.constant -1.000000e+01 : f32
    %34 = vector.broadcast %cst_12 : f32 to vector<1x4xf32>
    %35 = arith.mulf %34, %33 : vector<1x4xf32>
    %36 = math.exp %35 : vector<1x4xf32>
    %cst_13 = arith.constant 0.000000e+00 : f32
    %37 = vector.broadcast %cst_13 : f32 to vector<1x4xf32>
    %38 = arith.select %10, %36, %37 : vector<1x4xi1>, vector<1x4xf32>
    %39 = vector.shape_cast %38 : vector<1x4xf32> to vector<1x1x4xf32>
    %cst_14 = arith.constant dense<0.000000e+00> : vector<1xf32>
    %40 = vector.multi_reduction <add>, %39, %cst_14 [1, 2] : vector<1x1x4xf32> to vector<1xf32>
    %41 = vector.shape_cast %40 : vector<1xf32> to vector<1x1x1xf32>
    %42 = vector.extract %41[0, 0, 0] : f32 from vector<1x1x1xf32>
    %43 = arith.subf %14, %16 : vector<256x4xf32>
    %44 = arith.mulf %43, %43 : vector<256x4xf32>
    %cst_15 = arith.constant dense<0.000000e+00> : vector<4xf32>
    %45 = vector.multi_reduction <add>, %44, %cst_15 [0] : vector<256x4xf32> to vector<4xf32>
    %46 = vector.shape_cast %45 : vector<4xf32> to vector<1x4xf32>
    %cst_16 = arith.constant -1.000000e+01 : f32
    %47 = vector.broadcast %cst_16 : f32 to vector<1x4xf32>
    %48 = arith.mulf %47, %46 : vector<1x4xf32>
    %49 = math.exp %48 : vector<1x4xf32>
    %cst_17 = arith.constant 0.000000e+00 : f32
    %50 = vector.broadcast %cst_17 : f32 to vector<1x4xf32>
    %51 = arith.select %10, %49, %50 : vector<1x4xi1>, vector<1x4xf32>
    %52 = vector.shape_cast %51 : vector<1x4xf32> to vector<1x1x4xf32>
    %cst_18 = arith.constant dense<0.000000e+00> : vector<1xf32>
    %53 = vector.multi_reduction <add>, %52, %cst_18 [1, 2] : vector<1x1x4xf32> to vector<1xf32>
    %54 = vector.shape_cast %53 : vector<1xf32> to vector<1x1x1xf32>
    %55 = vector.extract %54[0, 0, 0] : f32 from vector<1x1x1xf32>
    %56 = tpu.iota {dimensions = array<i32: 1>} : vector<1x3x3xi32>
    %57 = tpu.iota {dimensions = array<i32: 2>} : vector<1x3x3xi32>
    %cst_19 = arith.constant 0.000000e+00 : f32
    %58 = vector.broadcast %cst_19 : f32 to vector<1x3x3xf32>
    %c0_i32_20 = arith.constant 0 : i32
    %59 = vector.broadcast %c0_i32_20 : i32 to vector<1x3x3xi32>
    %60 = arith.cmpi eq, %56, %59 : vector<1x3x3xi32>
    %c1_i32_21 = arith.constant 1 : i32
    %61 = vector.broadcast %c1_i32_21 : i32 to vector<1x3x3xi32>
    %62 = arith.cmpi eq, %57, %61 : vector<1x3x3xi32>
    %63 = arith.andi %60, %62 : vector<1x3x3xi1>
    %c1_i32_22 = arith.constant 1 : i32
    %64 = vector.broadcast %c1_i32_22 : i32 to vector<1x3x3xi32>
    %65 = arith.cmpi eq, %56, %64 : vector<1x3x3xi32>
    %c0_i32_23 = arith.constant 0 : i32
    %66 = vector.broadcast %c0_i32_23 : i32 to vector<1x3x3xi32>
    %67 = arith.cmpi eq, %57, %66 : vector<1x3x3xi32>
    %68 = arith.andi %65, %67 : vector<1x3x3xi1>
    %69 = arith.ori %63, %68 : vector<1x3x3xi1>
    %cst_24 = arith.constant 0.000000e+00 : f32
    %70 = vector.broadcast %29 : f32 to vector<1x3x3xf32>
    %71 = vector.broadcast %cst_24 : f32 to vector<1x3x3xf32>
    %72 = arith.select %69, %70, %71 : vector<1x3x3xi1>, vector<1x3x3xf32>
    %73 = arith.addf %58, %72 : vector<1x3x3xf32>
    %c0_i32_25 = arith.constant 0 : i32
    %74 = vector.broadcast %c0_i32_25 : i32 to vector<1x3x3xi32>
    %75 = arith.cmpi eq, %56, %74 : vector<1x3x3xi32>
    %c2_i32 = arith.constant 2 : i32
    %76 = vector.broadcast %c2_i32 : i32 to vector<1x3x3xi32>
    %77 = arith.cmpi eq, %57, %76 : vector<1x3x3xi32>
    %78 = arith.andi %75, %77 : vector<1x3x3xi1>
    %c2_i32_26 = arith.constant 2 : i32
    %79 = vector.broadcast %c2_i32_26 : i32 to vector<1x3x3xi32>
    %80 = arith.cmpi eq, %56, %79 : vector<1x3x3xi32>
    %c0_i32_27 = arith.constant 0 : i32
    %81 = vector.broadcast %c0_i32_27 : i32 to vector<1x3x3xi32>
    %82 = arith.cmpi eq, %57, %81 : vector<1x3x3xi32>
    %83 = arith.andi %80, %82 : vector<1x3x3xi1>
    %84 = arith.ori %78, %83 : vector<1x3x3xi1>
    %cst_28 = arith.constant 0.000000e+00 : f32
    %85 = vector.broadcast %42 : f32 to vector<1x3x3xf32>
    %86 = vector.broadcast %cst_28 : f32 to vector<1x3x3xf32>
    %87 = arith.select %84, %85, %86 : vector<1x3x3xi1>, vector<1x3x3xf32>
    %88 = arith.addf %73, %87 : vector<1x3x3xf32>
    %c1_i32_29 = arith.constant 1 : i32
    %89 = vector.broadcast %c1_i32_29 : i32 to vector<1x3x3xi32>
    %90 = arith.cmpi eq, %56, %89 : vector<1x3x3xi32>
    %c2_i32_30 = arith.constant 2 : i32
    %91 = vector.broadcast %c2_i32_30 : i32 to vector<1x3x3xi32>
    %92 = arith.cmpi eq, %57, %91 : vector<1x3x3xi32>
    %93 = arith.andi %90, %92 : vector<1x3x3xi1>
    %c2_i32_31 = arith.constant 2 : i32
    %94 = vector.broadcast %c2_i32_31 : i32 to vector<1x3x3xi32>
    %95 = arith.cmpi eq, %56, %94 : vector<1x3x3xi32>
    %c1_i32_32 = arith.constant 1 : i32
    %96 = vector.broadcast %c1_i32_32 : i32 to vector<1x3x3xi32>
    %97 = arith.cmpi eq, %57, %96 : vector<1x3x3xi32>
    %98 = arith.andi %95, %97 : vector<1x3x3xi1>
    %99 = arith.ori %93, %98 : vector<1x3x3xi1>
    %cst_33 = arith.constant 0.000000e+00 : f32
    %100 = vector.broadcast %55 : f32 to vector<1x3x3xf32>
    %101 = vector.broadcast %cst_33 : f32 to vector<1x3x3xf32>
    %102 = arith.select %99, %100, %101 : vector<1x3x3xi1>, vector<1x3x3xf32>
    %103 = arith.addf %88, %102 : vector<1x3x3xf32>
    %c0_34 = arith.constant 0 : index
    %c0_35 = arith.constant 0 : index
    %c0_36 = arith.constant 0 : index
    %104 = vector.load %arg3[%c0_34, %c0_35, %c0_36] : memref<1x3x3xf32, #tpu.memory_space<vmem>>, vector<1x3x3xf32>
    %105 = arith.addf %104, %103 : vector<1x3x3xf32>
    %c0_37 = arith.constant 0 : index
    %c0_38 = arith.constant 0 : index
    %c0_39 = arith.constant 0 : index
    %106 = vector.load %arg3[%c0_37, %c0_38, %c0_39] : memref<1x3x3xf32, #tpu.memory_space<vmem>>, vector<1x3x3xf32>
    tpu.vector_store %arg3[%c0_37, %c0_38, %c0_39], %105 {strides = array<i32>} : memref<1x3x3xf32, #tpu.memory_space<vmem>>, vector<1x3x3xf32>,
    return
  }
  func.func @transform_0(%arg0: i32, %arg1: i32) -> (i32, i32, i32) {
    %c1_i32 = arith.constant 1 : i32
    %0 = arith.muli %arg0, %c1_i32 : i32
    %1 = arith.addi %0, %arg1 : i32
    %c0_i32 = arith.constant 0 : i32
    %c0_i32_0 = arith.constant 0 : i32
    %c0_i32_1 = arith.constant 0 : i32
    return %c0_i32, %c0_i32_0, %1 : i32, i32, i32
  }
  func.func @transform_1(%arg0: i32, %arg1: i32) -> (i32, i32, i32) {
    %c0_i32 = arith.constant 0 : i32
    %c0_i32_0 = arith.constant 0 : i32
    %c0_i32_1 = arith.constant 0 : i32
    return %arg0, %c0_i32, %c0_i32_0 : i32, i32, i32
  }
}

</mosaic_0001>

<bundles_post_ra>
// kernel: custom-call.2
= control target key start
LH: loop header
LB: loop body
LE: loop exit
PB: predicated region body
PF: predicated region fallthrough
CT: control target
= control target key end

     0   :  { %5 = vsyncpa [#allocation8], 0  ;;  %v69_v1 = vlaneseq  ;;  %v523_v2 = vmov 0   ;;  %s552_s14 = smov 0   ;;  %s597_s0 = inlined_call_operand.vmem [shape: f32[3,3], index: 0, kind: input, shape index: {}]   ;;  %s598_s1 = inlined_call_operand.vmem [shape: f32[3,3], index: 1, kind: output, shape index: {0}]   ;;  %s599_s2 = inlined_call_operand.vmem [shape: s32[3], index: 2, kind: output, shape index: {1}]   ;;  %s600_s3 = inlined_call_operand.hbm [shape: s32[3], index: 3, kind: output, shape index: {2}]  }
   0x1   :  { %v60_v0 = vld [vmem:[%s597_s0] sm:$0xf]  ;;  %68 = vst [vmem:[#allocation4] sm:$0x1] %v523_v2 }
   0x2   :  { %61 = vst [vmem:[#allocation1] sm:$0xf] %v60_v0  ;;  %v549_v3 = vshrl.u32 %v69_v1, 7 }
   0x4   :  { %73 = vst [vmem:[#allocation9] sm:$0xff] %v549_v3 }
   0x9   :  { %v64_v4 = vld [vmem:[#allocation1] sm:$0xf] }
   0xa   :  { %65 = vst [vmem:[#allocation0] sm:$0xf] %v64_v4 }
  0x11   :  { %v66_v5 = vld [vmem:[#allocation0] sm:$0xff] }
  0x12   :  { %67 = vst [vmem:[#allocation2] sm:$0xff] %v66_v5 }
  0x13 LB: > { %vm89_vm0 = vcmp.lt.s32.totalorder %v549_v3, 3  ;;  %v559_v8 = vstv %s521_s14  ;;  %s130_s0 = ssub.s32 128, %s521_s14  ;;  %v136_v39 = vand.u32 127, %v69_v1  ;;  %s142_s15 = scalar_lea.vmem [#allocation2], %s521_s14  ;;  %v139_v42 = vld [vmem:[#allocation4] ss:$0 sm:$0xff]  ;;  %s521_s14 = sphi %s552_s14, %s79_s14  }
  0x14   : > { %vm88_vm1 = vcmp.ge.s32.totalorder %v549_v3, %v559_v8  ;;  %s148_s18 = scalar_lea.vmem [#allocation9], %s521_s14  ;;  %vm168_vm14 = vcmp.gt.s32.totalorder %v549_v3, %v559_v8  ;;  %s79_s14 = sadd.s32 1, %s521_s14  }
  0x15   : > { %vm90_vm3 = vmand %vm88_vm1, %vm89_vm0  ;;  %vm137_vm12 = vcmp.eq.s32.totalorder %v136_v39, %v559_v8  ;;  %v150_v44 = vld [vmem:[%s148_s18] ss:$0 sm:$0xff]  ;;  %p76_p0 = scmp.ge.s32.totalorder %s79_s14, 3  }
  0x16   :  { %s524_s24 = smov (%p76_p0), [#allocation7]   ;;  %s380_s28 = sshll.u32 (%p76_p0), %s600_s3, 4  ;;  %s381_s28 = int_to_ptr.hbm [resolvable:$true] %s380_s28 }
  0x17   :  { %s378_s25 = sshll.u32 (%p76_p0), %s524_s24, 4  ;;  %s379_s25 = int_to_ptr.vmem [resolvable:$true] %s378_s25 }
  0x19   : > { %v84_v6 = vld [vmem:[#allocation2] sm:$0xff]  ;;  %v144_v40 = vld [vmem:[%s142_s15] ss:$0 sm:$0xff] }
  0x1a   : > { %v85_v7 = vand.u32 2147483647, %v84_v6 }
  0x1c   : > { %vm468_vm2 = vcmp.gt.f32.partialorder %v85_v7, -inf }
  0x1d   : > { %vm92_vm4 = vmand %vm90_vm3, %vm468_vm2 }
  0x1e   : > { %v93_v9 = vsel %vm92_vm4, %v549_v3, %v559_v8  ;;  %v94_v10 = vsel %vm92_vm4, %v85_v7, -inf  ;;  %vm185_vm4 = vmand %vm168_vm14, %vm137_vm12 }
  0x1f   : > { %v95_v11 = vrot.slane %v94_v10, 1  ;;  %v96_v12 = vrot.slane %v93_v9, 1 }
  0x21   : > { %vm97_vm5 = vcmp.ge.f32.partialorder %v95_v11, %v94_v10  ;;  %v100_v13 = vrot.slane %v95_v11, 1  ;;  %v101_v14 = vrot.slane %v96_v12, 1 }
  0x22   : > { %v98_v15 = vsel %vm97_vm5, %v95_v11, %v94_v10  ;;  %v99_v16 = vsel %vm97_vm5, %v96_v12, %v93_v9  ;;  %vm160_vm5 = vcmp.gt.s32.totalorder %v136_v39, %v559_v8 }
  0x23   : > { %vm102_vm6 = vcmp.ge.f32.partialorder %v100_v13, %v98_v15  ;;  %v105_v17 = vrot.slane %v100_v13, 1  ;;  %v106_v18 = vrot.slane %v101_v14, 1 }
  0x24   : > { %v103_v19 = vsel %vm102_vm6, %v100_v13, %v98_v15  ;;  %v104_v20 = vsel %vm102_vm6, %v101_v14, %v99_v16 }
  0x25   : > { %vm107_vm7 = vcmp.ge.f32.partialorder %v105_v17, %v103_v19  ;;  %v110_v21 = vrot.slane %v105_v17, 1  ;;  %v111_v22 = vrot.slane %v106_v18, 1 }
  0x26   : > { %v108_v23 = vsel %vm107_vm7, %v105_v17, %v103_v19  ;;  %v109_v24 = vsel %vm107_vm7, %v106_v18, %v104_v20 }
  0x27   : > { %vm112_vm8 = vcmp.ge.f32.partialorder %v110_v21, %v108_v23  ;;  %v115_v25 = vrot.slane %v110_v21, 1  ;;  %v116_v26 = vrot.slane %v111_v22, 1 }
  0x28   : > { %v113_v27 = vsel %vm112_vm8, %v110_v21, %v108_v23  ;;  %v114_v28 = vsel %vm112_vm8, %v111_v22, %v109_v24 }
  0x29   : > { %vm117_vm9 = vcmp.ge.f32.partialorder %v115_v25, %v113_v27  ;;  %v120_v29 = vrot.slane %v115_v25, 1  ;;  %v121_v30 = vrot.slane %v116_v26, 1 }
  0x2a   : > { %v118_v31 = vsel %vm117_vm9, %v115_v25, %v113_v27  ;;  %v119_v32 = vsel %vm117_vm9, %v116_v26, %v114_v28 }
  0x2b   : > { %vm122_vm10 = vcmp.ge.f32.partialorder %v120_v29, %v118_v31  ;;  %v125_v33 = vrot.slane %v120_v29, 1  ;;  %v126_v34 = vrot.slane %v121_v30, 1 }
  0x2c   : > { %v123_v35 = vsel %vm122_vm10, %v120_v29, %v118_v31  ;;  %v124_v36 = vsel %vm122_vm10, %v121_v30, %v119_v32 }
  0x2d   : > { %vm127_vm11 = vcmp.ge.f32.partialorder %v125_v33, %v123_v35 }
  0x2e   : > { %v129_v37 = vsel %vm127_vm11, %v126_v34, %v124_v36 }
  0x2f   : > { %131 = vrot.lane.b32.xlu0 %v129_v37, %s130_s0 }
  0xa1   : > { %v132_v38 = vpop.permute.xlu0 %131 }
  0xa2   : > { %475 = vpush %v132_v38 }
  0xd3   : > { %s476_s16 = spop %475 }
  0xd4   : > { %v138_v41 = vstv %s476_s16  ;;  %s143_s17 = scalar_lea.vmem [#allocation2], %s476_s16  ;;  %s149_s19 = scalar_lea.vmem [#allocation9], %s476_s16 }
  0xd5   : > { %v145_v43 = vld [vmem:[%s143_s17] ss:$0 sm:$0xff]  ;;  %v140_v46 = vsel %vm137_vm12, %v138_v41, %v139_v42 }
  0xd6   : > { %v151_v45 = vld [vmem:[%s149_s19] ss:$0 sm:$0xff]  ;;  %146 = vst [vmem:[%s143_s17] sm:$0x1] %v144_v40  ;;  %vm154_vm13 = vcmp.ne.f32.partialorder %v145_v43, 0.0  ;;  %v161_v62 = vsel %vm160_vm5, %v145_v43, 0.0 }
  0xd7   : > { %147 = vst [vmem:[%s142_s15] sm:$0x1] %v145_v43  ;;  %vm155_vm15 = vmand %vm137_vm12, %vm154_vm13 }
  0xd8   : > { %152 = vst [vmem:[%s149_s19] sm:$0x1] %v150_v44  ;;  %v156_v47 = vsel %vm155_vm15, %v145_v43, 1.0 }
  0xd9   : > { %153 = vst [vmem:[%s148_s18] sm:$0x1] %v151_v45  ;;  %v169_v48 = vsel %vm168_vm14, %v156_v47, 1.0 }
  0xda   : > { %487 = vrcp.f32 %v169_v48  ;;  %141 = vst [vmem:[#allocation4] sm:$0x1] %v140_v46  ;;  %v181_v52 = vand.u32 2147483648, %v169_v48  ;;  %v179_v54 = vand.u32 2147483647, %v169_v48  ;;  %vm175_vm1 = vweird.f32 %v169_v48 }
  0xdc   : > { %v182_v56 = vor.u32 1.1754944e-38, %v181_v52  ;;  %vm180_vm3 = vcmp.eq.f32.partialorder %v179_v54, 8.507059e+37 }
  0xde   : > { %v165_v58 = vld [vmem:[#allocation2] sm:$0xff] }
  0xe0   : > { %v488_v49 = vpop.eup %487  ;;  %v192_v4 = vld [vmem:[#allocation9] sm:$0xff] (%p76_p0) }
  0xe1   : > { %v171_v50 = vmul.f32 %v488_v49, %v169_v48  ;;  %vm176_vm0 = vweird.f32 %v488_v49  ;;  %v249_v6 = vld [vmem:[#allocation4] sm:$0x1] (%p76_p0) }
  0xe2   : > { %vm177_vm2 = vmor %vm175_vm1, %vm176_vm0  ;;  %252 = vst [vmem:[#allocation5] sm:$0x1] (%p76_p0), %v249_v6 }
  0xe3   : > { %v172_v51 = vsub.f32 1.0, %v171_v50 }
  0xe5   : > { %v173_v53 = vmul.f32 %v488_v49, %v172_v51 }
  0xe7   : > { %v174_v55 = vadd.f32 %v488_v49, %v173_v53 }
  0xe9   : > { %v178_v57 = vsel %vm177_vm2, %v488_v49, %v174_v55  ;;  %v371_v8 = vld [vmem:[#allocation5] sm:$0x1] (%p76_p0) }
  0xea   : > { %v183_v59 = vsel %vm180_vm3, %v182_v56, %v178_v57  ;;  %372 = vst [vmem:[%s599_s2] sm:$0x1] (%p76_p0), %v371_v8 }
  0xeb   : > { %v184_v60 = vmul.f32 %v183_v59, %v165_v58 }
  0xed   : > { %v186_v61 = vsel %vm185_vm4, %v184_v60, 0.0 }
  0xee   : > { %187 = vadd.xlane.f32.xlu0 %v186_v61 }
 0x117   :  { %208 = vxpose.xlu0.b32.start.end [1/1] (short) (narrow) (%p76_p0), %v192_v4, 8 }
 0x161   : > { %v188_v63 = vpop.xlane.xlu0 %187 }
 0x162   : > { %v189_v0 = vmul.f32 %v188_v63, %v161_v62  ;;  %78 = sbr.rel (!%p76_p0) target bundleno = 19 (0x13), region = 163 }
 0x164   : > { %v190_v2 = vsub.f32 %v184_v60, %v189_v0 }
 0x166   : > { %191 = vst [vmem:[#allocation2] sm:$0xff] %v190_v2 }
 0x16d   :  { %v243_v5 = vld [vmem:[#allocation2] sm:$0xf] }
 0x16e   :  { %246 = vst [vmem:[#allocation3] sm:$0xf] %v243_v5 }
 0x175   :  { %v313_v7 = vld [vmem:[#allocation3] sm:$0xf] }
 0x176   :  { %314 = vst [vmem:[%s598_s1] sm:$0xf] %v313_v7 }
 0x1bb   :  { %v224_v9 = vpop.trf.xlu0 }
 0x1bc   :  { %240 = vst [vmem:[#allocation6] sm:$0x1] %v224_v9 }
 0x1c3   :  { %v255_v1 = vld [vmem:[#allocation6] sm:$0x1] }
 0x1c4   :  { %258 = vst [vmem:[#allocation7] sm:$0x1] %v255_v1 }
 0x1c5   :  { %383 = dma.vmem_to_hbm [thread:$0]  %s379_s25, 16, %s381_s28, [#allocation8]  }
 0x1c6   :  { %517 = dma.done.wait [#allocation8], 16  }
 0x1c7   :  { %518 = vsyncadd [#allocation8], 4294967280 }
 0x1c8   :  { %390 = vsyncpa [#allocation8], 1 }

// kernel: branch_diversity.1
= control target key start
LH: loop header
LB: loop body
LE: loop exit
PB: predicated region body
PF: predicated region fallthrough
CT: control target
= control target key end

     0   :  { %vm200_vm0 = vcmask 31744   ;;  %vm274_vm2 = vcmask 24576   ;;  %vm29_vm3 = vcmask 18432   ;;  %s1585_s0 = inlined_call_operand.vmem [shape: f32[3,256,4], index: 0, kind: input, shape index: {}]   ;;  %s1586_s1 = inlined_call_operand.vmem [shape: f32[1,3,3], index: 1, kind: output, shape index: {}]  }
   0x1   :  { %v710_v0 = vld [vmem:[%s1585_s0] sm:$0xff]  ;;  %v715_v1 = vld [vmem:[%s1585_s0 + $0x8] sm:$0xff]  ;;  %v720_v2 = vld [vmem:[%s1585_s0 + $0x10] sm:$0xff] }
   0x2   :  { %1630 = vst [vmem:[#allocation2_spill] sm:$0xff] %v710_v0  ;;  %v725_v3 = vld [vmem:[%s1585_s0 + $0x100] sm:$0xff]  ;;  %v730_v4 = vld [vmem:[%s1585_s0 + $0x108] sm:$0xff]  ;;  %v735_v5 = vld [vmem:[%s1585_s0 + $0x110] sm:$0xff] }
   0x3   :  { %1631 = vst [vmem:[#allocation3_spill] sm:$0xff] %v715_v1  ;;  %v740_v6 = vld [vmem:[%s1585_s0 + $0x18] sm:$0xff]  ;;  %v136_v8 = vsub.f32 %v710_v0, %v725_v3  ;;  %v137_v9 = vsub.f32 %v715_v1, %v730_v4  ;;  %v138_v10 = vsub.f32 %v720_v2, %v735_v5  ;;  %v756_v11 = vld [vmem:[%s1585_s0 + $0x20] sm:$0xff]  ;;  %v768_v14 = vld [vmem:[%s1585_s0 + $0x28] sm:$0xff] }
   0x4   :  { %1632 = vst [vmem:[#allocation4_spill] sm:$0xff] %v720_v2  ;;  %v745_v7 = vld [vmem:[%s1585_s0 + $0x118] sm:$0xff]  ;;  %v761_v12 = vld [vmem:[%s1585_s0 + $0x120] sm:$0xff]  ;;  %v773_v15 = vld [vmem:[%s1585_s0 + $0x128] sm:$0xff] }
   0x5   :  { %1633 = vst [vmem:[#allocation5_spill] sm:$0xff] %v740_v6  ;;  %v139_v13 = vsub.f32 %v740_v6, %v745_v7  ;;  %v778_v16 = vld [vmem:[%s1585_s0 + $0x30] sm:$0xff]  ;;  %v140_v18 = vsub.f32 %v756_v11, %v761_v12  ;;  %v168_v19 = vmul.f32 %v136_v8, %v136_v8  ;;  %v169_v20 = vmul.f32 %v137_v9, %v137_v9  ;;  %v792_v24 = vld [vmem:[%s1585_s0 + $0x38] sm:$0xff]  ;;  %v804_v27 = vld [vmem:[%s1585_s0 + $0x40] sm:$0xff] }
   0x6   :  { %1634 = vst [vmem:[#allocation6_spill] sm:$0xff] %v756_v11  ;;  %v783_v17 = vld [vmem:[%s1585_s0 + $0x130] sm:$0xff]  ;;  %v170_v21 = vmul.f32 %v138_v10, %v138_v10  ;;  %v141_v22 = vsub.f32 %v768_v14, %v773_v15  ;;  %v797_v25 = vld [vmem:[%s1585_s0 + $0x138] sm:$0xff]  ;;  %v809_v28 = vld [vmem:[%s1585_s0 + $0x48] sm:$0xff] }
   0x7   :  { %1635 = vst [vmem:[#allocation7_spill] sm:$0xff] %v768_v14  ;;  %v171_v23 = vmul.f32 %v139_v13, %v139_v13  ;;  %v142_v26 = vsub.f32 %v778_v16, %v783_v17  ;;  %v814_v29 = vld [vmem:[%s1585_s0 + $0x50] sm:$0xff]  ;;  %v172_v30 = vmul.f32 %v140_v18, %v140_v18  ;;  %v201_v31 = vsel %vm200_vm0, %v168_v19, 0.0  ;;  %v822_v34 = vld [vmem:[%s1585_s0 + $0x58] sm:$0xff]  ;;  %v827_v35 = vld [vmem:[%s1585_s0 + $0x60] sm:$0xff] }
   0x8   :  { %1636 = vst [vmem:[#allocation8_spill] sm:$0xff] %v778_v16  ;;  %v202_v32 = vsel %vm200_vm0, %v169_v20, 0.0  ;;  %v204_v33 = vsel %vm200_vm0, %v170_v21, 0.0  ;;  %v832_v36 = vld [vmem:[%s1585_s0 + $0x140] sm:$0xff]  ;;  %v837_v38 = vld [vmem:[%s1585_s0 + $0x68] sm:$0xff]  ;;  %v842_v39 = vld [vmem:[%s1585_s0 + $0x70] sm:$0xff]  ;;  %v143_v43 = vsub.f32 %v792_v24, %v797_v25  ;;  %v173_v44 = vmul.f32 %v141_v22, %v141_v22 }
   0x9   :  { %1637 = vst [vmem:[#allocation9_spill] sm:$0xff] %v792_v24  ;;  %v203_v37 = vadd.f32 %v202_v32, %v201_v31  ;;  %v847_v40 = vld [vmem:[%s1585_s0 + $0x78] sm:$0xff]  ;;  %v852_v41 = vld [vmem:[%s1585_s0 + $0x148] sm:$0xff]  ;;  %v857_v42 = vld [vmem:[%s1585_s0 + $0x150] sm:$0xff]  ;;  %v206_v45 = vsel %vm200_vm0, %v171_v23, 0.0  ;;  %v144_v57 = vsub.f32 %v804_v27, %v832_v36  ;;  %v174_v58 = vmul.f32 %v142_v26, %v142_v26 }
   0xa   :  { %1638 = vst [vmem:[#allocation10_spill] sm:$0xff] %v804_v27  ;;  %v865_v46 = vld [vmem:[%s1585_s0 + $0x80] sm:$0xff]  ;;  %v870_v47 = vld [vmem:[%s1585_s0 + $0x88] sm:$0xff]  ;;  %v875_v48 = vld [vmem:[%s1585_s0 + $0x158] sm:$0xff]  ;;  %v208_v59 = vsel %vm200_vm0, %v172_v30, 0.0  ;;  %v145_v9 = vsub.f32 %v809_v28, %v852_v41  ;;  %v146_v10 = vsub.f32 %v814_v29, %v857_v42  ;;  %v175_v31 = vmul.f32 %v143_v43, %v143_v43 }
   0xb   :  { %1639 = vst [vmem:[#allocation11_spill] sm:$0xff] %v809_v28  ;;  %v880_v49 = vld [vmem:[%s1585_s0 + $0x160] sm:$0xff]  ;;  %v205_v50 = vadd.f32 %v204_v33, %v203_v37  ;;  %v885_v51 = vld [vmem:[%s1585_s0 + $0x90] sm:$0xff]  ;;  %v890_v52 = vld [vmem:[%s1585_s0 + $0x98] sm:$0xff]  ;;  %v147_v26 = vsub.f32 %v822_v34, %v875_v48  ;;  %v210_v32 = vsel %vm200_vm0, %v173_v44, 0.0  ;;  %v212_v28 = vsel %vm200_vm0, %v174_v58, 0.0 }
   0xc   :  { %1640 = vst [vmem:[#allocation12_spill] sm:$0xff] %v814_v29  ;;  %v895_v53 = vld [vmem:[%s1585_s0 + $0xa0] sm:$0xff]  ;;  %v900_v54 = vld [vmem:[%s1585_s0 + $0x168] sm:$0xff]  ;;  %v905_v55 = vld [vmem:[%s1585_s0 + $0x170] sm:$0xff]  ;;  %v148_v30 = vsub.f32 %v827_v35, %v880_v49  ;;  %v177_v6 = vmul.f32 %v145_v9, %v145_v9  ;;  %v178_v0 = vmul.f32 %v146_v10, %v146_v10 }
   0xd   :  { %1641 = vst [vmem:[#allocation13_spill] sm:$0xff] %v822_v34  ;;  %v910_v56 = vld [vmem:[%s1585_s0 + $0x178] sm:$0xff]  ;;  %v918_v61 = vld [vmem:[%s1585_s0 + $0xa8] sm:$0xff]  ;;  %v923_v62 = vld [vmem:[%s1585_s0 + $0xb0] sm:$0xff]  ;;  %v207_v13 = vadd.f32 %v206_v45, %v205_v50  ;;  %v149_v44 = vsub.f32 %v837_v38, %v900_v54  ;;  %v150_v50 = vsub.f32 %v842_v39, %v905_v55  ;;  %v179_v10 = vmul.f32 %v147_v26, %v147_v26 }
   0xe   :  { %1642 = vst [vmem:[#allocation14_spill] sm:$0xff] %v827_v35  ;;  %v928_v63 = vld [vmem:[%s1585_s0 + $0x180] sm:$0xff]  ;;  %v933_v8 = vld [vmem:[%s1585_s0 + $0x188] sm:$0xff]  ;;  %v942_v18 = vld [vmem:[%s1585_s0 + $0xb8] sm:$0xff]  ;;  %v151_v60 = vsub.f32 %v847_v40, %v910_v56  ;;  %v220_v26 = vsel %vm200_vm0, %v178_v0, 0.0 }
   0xf   :  { %1643 = vst [vmem:[#allocation15_spill] sm:$0xff] %v837_v38  ;;  %v947_v19 = vld [vmem:[%s1585_s0 + $0xc0] sm:$0xff]  ;;  %v952_v20 = vld [vmem:[%s1585_s0 + $0xc8] sm:$0xff]  ;;  %v957_v21 = vld [vmem:[%s1585_s0 + $0x190] sm:$0xff]  ;;  %v209_v35 = vadd.f32 %v208_v59, %v207_v13  ;;  %v152_v59 = vsub.f32 %v865_v46, %v928_v63  ;;  %v153_v13 = vsub.f32 %v870_v47, %v933_v8 }
  0x10   :  { %1644 = vst [vmem:[#allocation16_spill] sm:$0xff] %v842_v39  ;;  %v962_v22 = vld [vmem:[%s1585_s0 + $0x198] sm:$0xff]  ;;  %v967_v23 = vld [vmem:[%s1585_s0 + $0x1a0] sm:$0xff]  ;;  %v977_v33 = vld [vmem:[%s1585_s0 + $0xd0] sm:$0xff]  ;;  %v176_v39 = vmul.f32 %v144_v57, %v144_v57  ;;  %v154_v57 = vsub.f32 %v885_v51, %v957_v21 }
  0x11   :  { %1645 = vst [vmem:[#allocation17_spill] sm:$0xff] %v847_v40  ;;  %v982_v37 = vld [vmem:[%s1585_s0 + $0xd8] sm:$0xff]  ;;  %v987_v45 = vld [vmem:[%s1585_s0 + $0x1a8] sm:$0xff]  ;;  %v992_v43 = vld [vmem:[%s1585_s0 + $0x1b0] sm:$0xff]  ;;  %v155_v58 = vsub.f32 %v890_v52, %v962_v22  ;;  %v211_v16 = vadd.f32 %v210_v32, %v209_v35  ;;  %v214_v35 = vsel %vm200_vm0, %v175_v31, 0.0  ;;  %v185_v0 = vmul.f32 %v153_v13, %v153_v13 }
  0x12   :  { %1646 = vst [vmem:[#allocation18_spill] sm:$0xff] %v865_v46  ;;  %v1003_v34 = vld [vmem:[%s1585_s0 + $0xe0] sm:$0xff]  ;;  %v1008_v29 = vld [vmem:[%s1585_s0 + $0x1b8] sm:$0xff]  ;;  %v1018_v40 = vld [vmem:[%s1585_s0 + $0x1c8] sm:$0xff] }
  0x13   :  { %1647 = vst [vmem:[#allocation19_spill] sm:$0xff] %v870_v47  ;;  %v1013_v38 = vld [vmem:[%s1585_s0 + $0x1c0] sm:$0xff]  ;;  %v1028_v27 = vld [vmem:[%s1585_s0 + $0xe8] sm:$0xff]  ;;  %v1033_v24 = vld [vmem:[%s1585_s0 + $0x1d0] sm:$0xff]  ;;  %v156_v47 = vsub.f32 %v895_v53, %v967_v23  ;;  %v1081_v9 = vsub.f32 %v952_v20, %v1018_v40  ;;  %v213_v31 = vadd.f32 %v212_v28, %v211_v16 }
  0x14   :  { %1648 = vst [vmem:[#allocation20_spill] sm:$0xff] %v885_v51  ;;  %v1038_v46 = vld [vmem:[%s1585_s0 + $0x1d8] sm:$0xff]  ;;  %v1049_v14 = vld [vmem:[%s1585_s0 + $0x1e0] sm:$0xff]  ;;  %v1054_v11 = vld [vmem:[%s1585_s0 + $0x1e8] sm:$0xff]  ;;  %v157_v51 = vsub.f32 %v918_v61, %v987_v45  ;;  %v1110_v28 = vsub.f32 %v977_v33, %v1033_v24 }
  0x15   :  { %1649 = vst [vmem:[#allocation21_spill] sm:$0xff] %v890_v52  ;;  %v1060_v52 = vsub.f32 %v923_v62, %v992_v43  ;;  %v1066_v32 = vld [vmem:[%s1585_s0 + $0x200] sm:$0xff]  ;;  %v1086_v2 = vld [vmem:[%s1585_s0 + $0x208] sm:$0xff]  ;;  %v1091_v1 = vld [vmem:[%s1585_s0 + $0x210] sm:$0xff] }
  0x16   :  { %1650 = vst [vmem:[#allocation22_spill] sm:$0xff] %v895_v53  ;;  %v1071_v53 = vld [vmem:[%s1585_s0 + $0xf0] sm:$0xff]  ;;  %v1106_v16 = vld [vmem:[%s1585_s0 + $0x1f8] sm:$0xff] }
  0x17   :  { %1651 = vst [vmem:[#allocation23_spill] sm:$0xff] %v918_v61  ;;  %v159_v61 = vsub.f32 %v942_v18, %v1008_v29 }
  0x18   :  { %1652 = vst [vmem:[#allocation24_spill] sm:$0xff] %v923_v62  ;;  %v1077_v62 = vsub.f32 %v947_v19, %v1013_v38 }
  0x19   :  { %1653 = vst [vmem:[#allocation25_spill] sm:$0xff] %v942_v18  ;;  %v1114_v18 = vsub.f32 %v982_v37, %v1038_v46 }
  0x1a   :  { %1654 = vst [vmem:[#allocation26_spill] sm:$0xff] %v947_v19  ;;  %v1096_v19 = vld [vmem:[%s1585_s0 + $0xf8] sm:$0xff] }
  0x1b   :  { %1655 = vst [vmem:[#allocation27_spill] sm:$0xff] %v952_v20  ;;  %v1101_v20 = vld [vmem:[%s1585_s0 + $0x1f0] sm:$0xff] }
  0x1c   :  { %1656 = vst [vmem:[#allocation28_spill] sm:$0xff] %v977_v33  ;;  %v1128_v33 = vld [vmem:[%s1585_s0 + $0x218] sm:$0xff] }
  0x1d   :  { %1657 = vst [vmem:[#allocation29_spill] sm:$0xff] %v982_v37  ;;  %v432_v37 = vsub.f32 %v725_v3, %v1066_v32  ;;  %v1148_v3 = vld [vmem:[%s1585_s0 + $0x220] sm:$0xff] }
  0x1e   :  { %1658 = vst [vmem:[#allocation30_spill] sm:$0xff] %v992_v43  ;;  %v215_v43 = vadd.f32 %v214_v35, %v213_v31  ;;  %v1139_v35 = vsub.f32 %v1071_v53, %v1101_v20  ;;  %v1143_v31 = vsub.f32 %v1096_v19, %v1106_v16 }
  0x1f   :  { %1659 = vst [vmem:[#allocation31_spill] sm:$0xff] %v1003_v34 }
  0x20   :  { %1660 = vst [vmem:[#allocation32_spill] sm:$0xff] %v1008_v29  ;;  %v1123_v29 = vsub.f32 %v1028_v27, %v1054_v11 }
  0x21   :  { %1661 = vst [vmem:[#allocation33_spill] sm:$0xff] %v1013_v38  ;;  %v1119_v38 = vsub.f32 %v1003_v34, %v1049_v14  ;;  %v433_v34 = vsub.f32 %v730_v4, %v1086_v2  ;;  %v182_v4 = vmul.f32 %v150_v50, %v150_v50 }
  0x22   :  { %1662 = vst [vmem:[#allocation34_spill] sm:$0xff] %v1018_v40  ;;  %v216_v40 = vsel %vm200_vm0, %v176_v39, 0.0  ;;  %v218_v39 = vsel %vm200_vm0, %v177_v6, 0.0  ;;  %v181_v6 = vmul.f32 %v149_v44, %v149_v44  ;;  %v436_v44 = vsub.f32 %v761_v12, %v1148_v3 }
  0x23   :  { %1663 = vst [vmem:[#allocation35_spill] sm:$0xff] %v1028_v27  ;;  %v180_v27 = vmul.f32 %v148_v30, %v148_v30  ;;  %v1156_v30 = vld [vmem:[%s1585_s0 + $0x228] sm:$0xff]  ;;  %v465_v50 = vmul.f32 %v433_v34, %v433_v34  ;;  %v189_v12 = vmul.f32 %v157_v51, %v157_v51  ;;  %v190_v51 = vmul.f32 %v1060_v52, %v1060_v52 }
  0x24   :  { %1664 = vst [vmem:[#allocation36_spill] sm:$0xff] %v1033_v24  ;;  %v1161_v24 = vmul.f32 %v155_v58, %v155_v58  ;;  %v1184_v58 = vmul.f32 %v159_v61, %v159_v61  ;;  %v1197_v52 = vmul.f32 %v1077_v62, %v1077_v62  ;;  %v1201_v61 = vmul.f32 %v1081_v9, %v1081_v9 }
  0x25   :  { %1665 = vst [vmem:[#allocation37_spill] sm:$0xff] %v1038_v46  ;;  %v1218_v9 = vmul.f32 %v1114_v18, %v1114_v18  ;;  %v1235_v18 = vmul.f32 %v1123_v29, %v1123_v29  ;;  %v1252_v29 = vmul.f32 %v1143_v31, %v1143_v31 }
  0x26   :  { %1666 = vst [vmem:[#allocation38_spill] sm:$0xff] %v1049_v14  ;;  %v434_v14 = vsub.f32 %v735_v5, %v1091_v1  ;;  %v435_v5 = vsub.f32 %v745_v7, %v1128_v33 }
  0x27   :  { %1667 = vst [vmem:[#allocation39_spill] sm:$0xff] %v1054_v11  ;;  %v217_v11 = vadd.f32 %v216_v40, %v215_v43  ;;  %v464_v40 = vmul.f32 %v432_v37, %v432_v37  ;;  %v222_v43 = vsel %vm200_vm0, %v179_v10, 0.0  ;;  %v224_v37 = vsel %vm200_vm0, %v180_v27, 0.0 }
  0x28   :  { %1668 = vst [vmem:[#allocation40_spill] sm:$0xff] %v1071_v53  ;;  %v183_v53 = vmul.f32 %v151_v60, %v151_v60  ;;  %v188_v60 = vmul.f32 %v156_v47, %v156_v47  ;;  %v467_v10 = vmul.f32 %v435_v5, %v435_v5  ;;  %v497_v27 = vsel %vm200_vm0, %v465_v50, 0.0 }
  0x29   :  { %1669 = vst [vmem:[#allocation41_spill] sm:$0xff] %v1096_v19  ;;  %v219_v46 = vadd.f32 %v218_v39, %v217_v11  ;;  %v466_v19 = vmul.f32 %v434_v14, %v434_v14  ;;  %v1166_v11 = vld [vmem:[%s1585_s0 + $0x230] sm:$0xff]  ;;  %v226_v14 = vsel %vm200_vm0, %v181_v6, 0.0  ;;  %v496_v13 = vsel %vm200_vm0, %v464_v40, 0.0  ;;  %v1189_v6 = vld [vmem:[%s1585_s0 + $0x240] sm:$0xff] }
  0x2a   :  { %1670 = vst [vmem:[#allocation42_spill] sm:$0xff] %v1101_v20  ;;  %v184_v20 = vmul.f32 %v152_v59, %v152_v59  ;;  %v437_v59 = vsub.f32 %v773_v15, %v1156_v30  ;;  %v438_v47 = vsub.f32 %v783_v17, %v1166_v11  ;;  %v228_v5 = vsel %vm200_vm0, %v182_v4, 0.0 }
  0x2b   :  { %1671 = vst [vmem:[#allocation43_spill] sm:$0xff] %v1106_v16  ;;  %v186_v16 = vmul.f32 %v154_v57, %v154_v57  ;;  %v221_v7 = vadd.f32 %v220_v26, %v219_v46  ;;  %v1175_v46 = vld [vmem:[%s1585_s0 + $0x238] sm:$0xff]  ;;  %v468_v57 = vmul.f32 %v436_v44, %v436_v44  ;;  %v499_v15 = vsel %vm200_vm0, %v466_v19, 0.0  ;;  %v1206_v44 = vld [vmem:[%s1585_s0 + $0x248] sm:$0xff] }
  0x2c   :  { %v498_v26 = vadd.f32 %v497_v27, %v496_v13  ;;  %v439_v17 = vsub.f32 %v797_v25, %v1175_v46  ;;  %v469_v40 = vmul.f32 %v437_v59, %v437_v59  ;;  %v501_v19 = vsel %vm200_vm0, %v467_v10, 0.0  ;;  %v1223_v10 = vld [vmem:[%s1585_s0 + $0x250] sm:$0xff] }
  0x2d   :  { %v223_v34 = vadd.f32 %v222_v43, %v221_v7  ;;  %v230_v25 = vsel %vm200_vm0, %v183_v53, 0.0  ;;  %v440_v50 = vsub.f32 %v832_v36, %v1189_v6  ;;  %v470_v7 = vmul.f32 %v438_v47, %v438_v47 }
  0x2e   :  { %v500_v4 = vadd.f32 %v499_v15, %v498_v26  ;;  %v503_v62 = vsel %vm200_vm0, %v468_v57, 0.0  ;;  %v232_v36 = vsel %vm200_vm0, %v184_v20, 0.0  ;;  %v1231_v13 = vmul.f32 %v1119_v38, %v1119_v38  ;;  %v1240_v57 = vld [vmem:[%s1585_s0 + $0x258] sm:$0xff] }
  0x2f   :  { %v225_v39 = vadd.f32 %v224_v37, %v223_v34  ;;  %v1214_v37 = vmul.f32 %v1110_v28, %v1110_v28  ;;  %v441_v34 = vsub.f32 %v852_v41, %v1206_v44  ;;  %v505_v28 = vsel %vm200_vm0, %v469_v40, 0.0 }
  0x30   :  { %v502_v53 = vadd.f32 %v501_v19, %v500_v4  ;;  %v234_v41 = vsel %vm200_vm0, %v185_v0, 0.0  ;;  %v442_v27 = vsub.f32 %v857_v42, %v1223_v10  ;;  %v472_v15 = vmul.f32 %v440_v50, %v440_v50 }
  0x31   :  { %v227_v43 = vadd.f32 %v226_v14, %v225_v39  ;;  %v471_v14 = vmul.f32 %v439_v17, %v439_v17  ;;  %v507_v38 = vsel %vm200_vm0, %v470_v7, 0.0  ;;  %v1248_v39 = vmul.f32 %v1139_v35, %v1139_v35  ;;  %v1263_v17 = vld [vmem:[%s1585_s0 + $0x268] sm:$0xff]  ;;  %v1285_v7 = vld [vmem:[%s1585_s0 + $0x280] sm:$0xff] }
  0x32   :  { %v504_v20 = vadd.f32 %v503_v62, %v502_v53  ;;  %v236_v42 = vsel %vm200_vm0, %v186_v16, 0.0  ;;  %v443_v35 = vsub.f32 %v875_v48, %v1240_v57  ;;  %v473_v40 = vmul.f32 %v441_v34, %v441_v34  ;;  %v1274_v16 = vld [vmem:[%s1585_s0 + $0x270] sm:$0xff] }
  0x33   :  { %v229_v59 = vadd.f32 %v228_v5, %v227_v43  ;;  %v1257_v5 = vld [vmem:[%s1585_s0 + $0x260] sm:$0xff]  ;;  %v509_v31 = vsel %vm200_vm0, %v471_v14, 0.0  ;;  %v238_v43 = vsel %vm200_vm0, %v1161_v24, 0.0  ;;  %v240_v4 = vsel %vm200_vm0, %v188_v60, 0.0  ;;  %v1306_v14 = vld [vmem:[%s1585_s0 + $0x298] sm:$0xff] }
  0x34   :  { %v506_v0 = vadd.f32 %v505_v28, %v504_v20  ;;  %v242_v50 = vsel %vm200_vm0, %v189_v12, 0.0  ;;  %v444_v24 = vsub.f32 %v880_v49, %v1257_v5  ;;  %v474_v60 = vmul.f32 %v442_v27, %v442_v27  ;;  %v1299_v12 = vld [vmem:[%s1585_s0 + $0x290] sm:$0xff] }
  0x35   :  { %v231_v47 = vadd.f32 %v230_v25, %v229_v59  ;;  %v1279_v25 = vld [vmem:[%s1585_s0 + $0x278] sm:$0xff]  ;;  %v511_v62 = vsel %vm200_vm0, %v472_v15, 0.0  ;;  %v244_v53 = vsel %vm200_vm0, %v190_v51, 0.0  ;;  %v445_v34 = vsub.f32 %v900_v54, %v1263_v17  ;;  %v1311_v51 = vld [vmem:[%s1585_s0 + $0x2a0] sm:$0xff]  ;;  %v1323_v15 = vld [vmem:[%s1585_s0 + $0x2a8] sm:$0xff] }
  0x36   :  { %v508_v48 = vadd.f32 %v507_v38, %v506_v0  ;;  %v446_v28 = vsub.f32 %v905_v55, %v1274_v16  ;;  %v475_v20 = vmul.f32 %v443_v35, %v443_v35  ;;  %v513_v54 = vsel %vm200_vm0, %v473_v40, 0.0  ;;  %v1330_v55 = vld [vmem:[%s1585_s0 + $0x2b0] sm:$0xff] }
  0x37   :  { %v233_v26 = vadd.f32 %v232_v36, %v231_v47  ;;  %v1294_v36 = vld [vmem:[%s1585_s0 + $0x288] sm:$0xff]  ;;  %v447_v47 = vsub.f32 %v910_v56, %v1279_v25  ;;  %v246_v27 = vsel %vm200_vm0, %v1184_v58, 0.0  ;;  %v448_v38 = vsub.f32 %v928_v63, %v1285_v7  ;;  %v1340_v63 = vld [vmem:[%s1585_s0 + $0x2b8] sm:$0xff] }
  0x38   :  { %v510_v49 = vadd.f32 %v509_v31, %v508_v48  ;;  %v449_v56 = vsub.f32 %v933_v8, %v1294_v36  ;;  %v450_v58 = vsub.f32 %v957_v21, %v1299_v12  ;;  %v476_v0 = vmul.f32 %v444_v24, %v444_v24 }
  0x39   :  { %v235_v19 = vadd.f32 %v234_v41, %v233_v26  ;;  %v451_v40 = vsub.f32 %v962_v22, %v1306_v14  ;;  %v452_v31 = vsub.f32 %v967_v23, %v1311_v51  ;;  %v248_v8 = vsel %vm200_vm0, %v1197_v52, 0.0  ;;  %v1356_v22 = vld [vmem:[%s1585_s0 + $0x2c0] sm:$0xff] }
  0x3a   :  { %v512_v26 = vadd.f32 %v511_v62, %v510_v49  ;;  %v453_v21 = vsub.f32 %v987_v45, %v1323_v15  ;;  %v250_v24 = vsel %vm200_vm0, %v1201_v61, 0.0  ;;  %v1672_v23 = vld [vmem:[#allocation30_spill] sm:$0xff]  ;;  %v252_v52 = vsel %vm200_vm0, %v1214_v37, 0.0  ;;  %v1673_v45 = vld [vmem:[#allocation32_spill] sm:$0xff] }
  0x3b   :  { %v237_v59 = vadd.f32 %v236_v42, %v235_v19  ;;  %v515_v42 = vsel %vm200_vm0, %v474_v60, 0.0  ;;  %v454_v60 = vsub.f32 %v1672_v23, %v1330_v55  ;;  %v254_v61 = vsel %vm200_vm0, %v1218_v9, 0.0 }
  0x3c   :  { %v514_v19 = vadd.f32 %v513_v54, %v512_v26  ;;  %v1674_v26 = vld [vmem:[#allocation33_spill] sm:$0xff]  ;;  %v256_v9 = vsel %vm200_vm0, %v1231_v13, 0.0  ;;  %v485_v23 = vmul.f32 %v453_v21, %v453_v21 }
  0x3d   :  { %v239_v41 = vadd.f32 %v238_v43, %v237_v59  ;;  %v477_v43 = vmul.f32 %v445_v34, %v445_v34  ;;  %v455_v59 = vsub.f32 %v1673_v45, %v1340_v63  ;;  %v478_v34 = vmul.f32 %v446_v28, %v446_v28  ;;  %v1390_v13 = vld [vmem:[%s1585_s0 + $0x2d8] sm:$0xff]  ;;  %v1677_v45 = vld [vmem:[#allocation3_spill] sm:$0xff] }
  0x3e   :  { %v516_v62 = vadd.f32 %v515_v42, %v514_v19  ;;  %v456_v37 = vsub.f32 %v1674_v26, %v1356_v22  ;;  %v480_v42 = vmul.f32 %v448_v38, %v448_v38  ;;  %v486_v26 = vmul.f32 %v454_v60, %v454_v60 }
  0x3f   :  { %v241_v35 = vadd.f32 %v240_v4, %v239_v41  ;;  %v517_v4 = vsel %vm200_vm0, %v475_v20, 0.0  ;;  %v479_v20 = vmul.f32 %v447_v47, %v447_v47  ;;  %v1370_v41 = vld [vmem:[%s1585_s0 + $0x2c8] sm:$0xff]  ;;  %v521_v28 = vsel %vm200_vm0, %v477_v43, 0.0  ;;  %v1380_v47 = vld [vmem:[%s1585_s0 + $0x2d0] sm:$0xff] }
  0x40   :  { %v518_v54 = vadd.f32 %v517_v4, %v516_v62  ;;  %v484_v4 = vmul.f32 %v452_v31, %v452_v31  ;;  %v523_v62 = vsel %vm200_vm0, %v478_v34, 0.0  ;;  %v1676_v31 = vld [vmem:[#allocation2_spill] sm:$0xff]  ;;  %v1678_v34 = vld [vmem:[#allocation4_spill] sm:$0xff] }
  0x41   :  { %v243_v48 = vadd.f32 %v242_v50, %v241_v35  ;;  %v519_v50 = vsel %vm200_vm0, %v476_v0, 0.0  ;;  %v481_v35 = vmul.f32 %v449_v56, %v449_v56  ;;  %v482_v0 = vmul.f32 %v450_v58, %v450_v58 }
  0x42   :  { %v258_v56 = vsel %vm200_vm0, %v1235_v18, 0.0  ;;  %v525_v43 = vsel %vm200_vm0, %v479_v20, 0.0  ;;  %v285_v21 = vsub.f32 %v1676_v31, %v1066_v32  ;;  %v287_v18 = vsub.f32 %v1678_v34, %v1091_v1  ;;  %v1680_v32 = vld [vmem:[#allocation5_spill] sm:$0xff]  ;;  %v1409_v1 = vld [vmem:[%s1585_s0 + $0x2e0] sm:$0xff] }
  0x43   :  { %v245_v49 = vadd.f32 %v244_v53, %v243_v48  ;;  %v483_v53 = vmul.f32 %v451_v40, %v451_v40  ;;  %v520_v48 = vadd.f32 %v519_v50, %v518_v54  ;;  %v527_v20 = vsel %vm200_vm0, %v480_v42, 0.0 }
  0x45   :  { %v247_v19 = vadd.f32 %v246_v27, %v245_v49  ;;  %v1675_v27 = vld [vmem:[#allocation34_spill] sm:$0xff]  ;;  %v522_v40 = vadd.f32 %v521_v28, %v520_v48  ;;  %v1679_v49 = vld [vmem:[#allocation36_spill] sm:$0xff]  ;;  %v487_v48 = vmul.f32 %v455_v59, %v455_v59 }
  0x46   :  { %v457_v58 = vsub.f32 %v1675_v27, %v1370_v41  ;;  %v458_v54 = vsub.f32 %v1679_v49, %v1380_v47  ;;  %v288_v27 = vsub.f32 %v1680_v32, %v1128_v33  ;;  %v262_v33 = vsel %vm200_vm0, %v1252_v29, 0.0  ;;  %v1431_v29 = vld [vmem:[%s1585_s0 + $0x2e8] sm:$0xff] }
  0x47   :  { %v249_v38 = vadd.f32 %v248_v8, %v247_v19  ;;  %v286_v8 = vsub.f32 %v1677_v45, %v1086_v2  ;;  %v524_v28 = vadd.f32 %v523_v62, %v522_v40  ;;  %v260_v19 = vsel %vm200_vm0, %v1248_v39, 0.0  ;;  %v1681_v2 = vld [vmem:[#allocation37_spill] sm:$0xff]  ;;  %v1682_v39 = vld [vmem:[#allocation6_spill] sm:$0xff] }
  0x48   :  { %v529_v62 = vsel %vm200_vm0, %v481_v35, 0.0  ;;  %v289_v59 = vsub.f32 %v1682_v39, %v1148_v3  ;;  %v319_v40 = vmul.f32 %v287_v18, %v287_v18  ;;  %v1684_v35 = vld [vmem:[#allocation7_spill] sm:$0xff]  ;;  %v320_v32 = vmul.f32 %v288_v27, %v288_v27 }
  0x49   :  { %v251_v50 = vadd.f32 %v250_v24, %v249_v38  ;;  %v459_v24 = vsub.f32 %v1681_v2, %v1390_v13  ;;  %v526_v60 = vadd.f32 %v525_v43, %v524_v28  ;;  %v317_v38 = vmul.f32 %v285_v21, %v285_v21 }
  0x4a   :  { %v318_v42 = vmul.f32 %v286_v8, %v286_v8  ;;  %v531_v43 = vsel %vm200_vm0, %v482_v0, 0.0  ;;  %v290_v28 = vsub.f32 %v1684_v35, %v1156_v30  ;;  %v533_v8 = vsel %vm200_vm0, %v483_v53, 0.0 }
  0x4b   :  { %v253_v31 = vadd.f32 %v252_v52, %v251_v50  ;;  %v488_v52 = vmul.f32 %v456_v37, %v456_v37  ;;  %v528_v34 = vadd.f32 %v527_v20, %v526_v60  ;;  %v1683_v50 = vld [vmem:[#allocation38_spill] sm:$0xff]  ;;  %v321_v37 = vmul.f32 %v289_v59, %v289_v59  ;;  %v1687_v59 = vld [vmem:[#allocation39_spill] sm:$0xff] }
  0x4c   :  { %v1420_v49 = vsub.f32 %v1683_v50, %v1409_v1  ;;  %v349_v20 = vsel %vm200_vm0, %v317_v38, 0.0  ;;  %v350_v0 = vsel %vm200_vm0, %v318_v42, 0.0  ;;  %v352_v30 = vsel %vm200_vm0, %v319_v40, 0.0 }
  0x4d   :  { %v255_v45 = vadd.f32 %v254_v61, %v253_v31  ;;  %v530_v21 = vadd.f32 %v529_v62, %v528_v34  ;;  %v1685_v61 = vld [vmem:[#allocation8_spill] sm:$0xff]  ;;  %v351_v2 = vadd.f32 %v350_v0, %v349_v20  ;;  %v535_v53 = vsel %vm200_vm0, %v484_v4, 0.0  ;;  %v1688_v4 = vld [vmem:[#allocation10_spill] sm:$0xff] }
  0x4e   :  { %v291_v18 = vsub.f32 %v1685_v61, %v1166_v11  ;;  %v1686_v11 = vld [vmem:[#allocation9_spill] sm:$0xff]  ;;  %v322_v62 = vmul.f32 %v290_v28, %v290_v28  ;;  %v354_v39 = vsel %vm200_vm0, %v320_v32, 0.0  ;;  %v461_v38 = vsub.f32 %v1687_v59, %v1431_v29 }
  0x4f   :  { %v257_v3 = vadd.f32 %v256_v9, %v255_v45  ;;  %v489_v9 = vmul.f32 %v457_v58, %v457_v58  ;;  %v532_v31 = vadd.f32 %v531_v43, %v530_v21  ;;  %v292_v60 = vsub.f32 %v1686_v11, %v1175_v46 }
  0x50   :  { %v353_v42 = vadd.f32 %v352_v30, %v351_v2  ;;  %v537_v58 = vsel %vm200_vm0, %v485_v23, 0.0  ;;  %v293_v40 = vsub.f32 %v1688_v4, %v1189_v6  ;;  %v323_v46 = vmul.f32 %v291_v18, %v291_v18  ;;  %v1690_v23 = vld [vmem:[#allocation42_spill] sm:$0xff] }
  0x51   :  { %v259_v27 = vadd.f32 %v258_v56, %v257_v3  ;;  %v534_v34 = vadd.f32 %v533_v8, %v532_v31  ;;  %v1445_v56 = vld [vmem:[%s1585_s0 + $0x2f0] sm:$0xff]  ;;  %v356_v50 = vsel %vm200_vm0, %v321_v37, 0.0  ;;  %v539_v32 = vsel %vm200_vm0, %v486_v26, 0.0  ;;  %v1689_v3 = vld [vmem:[#allocation11_spill] sm:$0xff] }
  0x52   :  { %v355_v28 = vadd.f32 %v354_v39, %v353_v42  ;;  %v294_v21 = vsub.f32 %v1689_v3, %v1206_v44  ;;  %v324_v8 = vmul.f32 %v292_v60, %v292_v60  ;;  %v358_v61 = vsel %vm200_vm0, %v322_v62, 0.0  ;;  %v1691_v26 = vld [vmem:[#allocation12_spill] sm:$0xff]  ;;  %v1692_v60 = vld [vmem:[#allocation13_spill] sm:$0xff] }
  0x53   :  { %v261_v45 = vadd.f32 %v260_v19, %v259_v27  ;;  %v490_v19 = vmul.f32 %v458_v54, %v458_v54  ;;  %v536_v35 = vadd.f32 %v535_v53, %v534_v34  ;;  %v462_v0 = vsub.f32 %v1690_v23, %v1445_v56  ;;  %v1460_v54 = vld [vmem:[%s1585_s0 + $0x2f8] sm:$0xff]  ;;  %v1696_v23 = vld [vmem:[#allocation16_spill] sm:$0xff] }
  0x54   :  { %v357_v18 = vadd.f32 %v356_v50, %v355_v28  ;;  %v295_v37 = vsub.f32 %v1691_v26, %v1223_v10  ;;  %v325_v44 = vmul.f32 %v293_v40, %v293_v40  ;;  %v360_v30 = vsel %vm200_vm0, %v323_v46, 0.0  ;;  %v1695_v28 = vld [vmem:[#allocation15_spill] sm:$0xff] }
  0x55   :  { %v263_v43 = vadd.f32 %v262_v33, %v261_v45  ;;  %v538_v6 = vadd.f32 %v537_v58, %v536_v35  ;;  %v541_v33 = vsel %vm200_vm0, %v487_v48, 0.0  ;;  %v491_v31 = vmul.f32 %v459_v24, %v459_v24  ;;  %v1693_v48 = vld [vmem:[#allocation43_spill] sm:$0xff]  ;;  %v1694_v24 = vld [vmem:[#allocation14_spill] sm:$0xff] }
  0x56   :  { %v359_v53 = vadd.f32 %v358_v61, %v357_v18  ;;  %v543_v11 = vsel %vm200_vm0, %v488_v52, 0.0  ;;  %v296_v62 = vsub.f32 %v1692_v60, %v1240_v57  ;;  %v326_v39 = vmul.f32 %v294_v21, %v294_v21  ;;  %v1698_v60 = vld [vmem:[#allocation18_spill] sm:$0xff] }
  0x57   :  { %v264_v20 = vrot.slane %v263_v43, 4  ;;  %v540_v2 = vadd.f32 %v539_v32, %v538_v6  ;;  %v362_v45 = vsel %vm200_vm0, %v324_v8, 0.0  ;;  %v463_v34 = vsub.f32 %v1693_v48, %v1460_v54 }
  0x58   :  { %v361_v42 = vadd.f32 %v360_v30, %v359_v53  ;;  %v545_v58 = vsel %vm200_vm0, %v489_v9, 0.0  ;;  %v297_v4 = vsub.f32 %v1694_v24, %v1257_v5  ;;  %v327_v40 = vmul.f32 %v295_v37, %v295_v37 }
  0x59   :  { %v265_v27 = vadd.f32 %v264_v20, %v263_v43  ;;  %v542_v10 = vadd.f32 %v541_v33, %v540_v2  ;;  %v364_v52 = vsel %vm200_vm0, %v325_v44, 0.0  ;;  %v492_v57 = vmul.f32 %v1420_v49, %v1420_v49  ;;  %v1697_v44 = vld [vmem:[#allocation17_spill] sm:$0xff] }
  0x5a   :  { %v363_v43 = vadd.f32 %v362_v45, %v361_v42  ;;  %v547_v35 = vsel %vm200_vm0, %v490_v19, 0.0  ;;  %v298_v32 = vsub.f32 %v1695_v28, %v1263_v17  ;;  %v328_v3 = vmul.f32 %v296_v62, %v296_v62 }
  0x5b   :  { %v266_v59 = vrot.slane %v265_v27, 2  ;;  %v544_v50 = vadd.f32 %v543_v11, %v542_v10  ;;  %v366_v9 = vsel %vm200_vm0, %v326_v39, 0.0  ;;  %v493_v8 = vmul.f32 %v461_v38, %v461_v38  ;;  %v1699_v10 = vld [vmem:[#allocation19_spill] sm:$0xff] }
  0x5c   :  { %v365_v61 = vadd.f32 %v364_v52, %v363_v43  ;;  %v549_v20 = vsel %vm200_vm0, %v491_v31, 0.0  ;;  %v299_v6 = vsub.f32 %v1696_v23, %v1274_v16  ;;  %v329_v49 = vmul.f32 %v297_v4, %v297_v4 }
  0x5d   :  { %v267_v46 = vadd.f32 %v266_v59, %v265_v27  ;;  %v546_v5 = vadd.f32 %v545_v58, %v544_v50  ;;  %v368_v18 = vsel %vm200_vm0, %v327_v40, 0.0  ;;  %v494_v19 = vmul.f32 %v462_v0, %v462_v0 }
  0x5e   :  { %v367_v37 = vadd.f32 %v366_v9, %v365_v61  ;;  %v551_v17 = vsel %vm200_vm0, %v492_v57, 0.0  ;;  %v300_v30 = vsub.f32 %v1697_v44, %v1279_v25  ;;  %v330_v38 = vmul.f32 %v298_v32, %v298_v32 }
  0x5f   :  { %v268_v21 = vrot.slane %v267_v46, 1  ;;  %v548_v26 = vadd.f32 %v547_v35, %v546_v5  ;;  %v370_v27 = vsel %vm200_vm0, %v328_v3, 0.0  ;;  %v495_v31 = vmul.f32 %v463_v34, %v463_v34  ;;  %v1703_v5 = vld [vmem:[#allocation22_spill] sm:$0xff] }
  0x60   :  { %v369_v11 = vadd.f32 %v368_v18, %v367_v37  ;;  %v553_v16 = vsel %vm200_vm0, %v493_v8, 0.0  ;;  %v301_v62 = vsub.f32 %v1698_v60, %v1285_v7  ;;  %v331_v0 = vmul.f32 %v299_v6, %v299_v6  ;;  %v1704_v18 = vld [vmem:[#allocation23_spill] sm:$0xff] }
  0x61   :  { %v269_v33 = vadd.f32 %v268_v21, %v267_v46  ;;  %v550_v53 = vadd.f32 %v549_v20, %v548_v26  ;;  %v372_v39 = vsel %vm200_vm0, %v329_v49, 0.0  ;;  %v555_v25 = vsel %vm200_vm0, %v494_v19, 0.0  ;;  %v1701_v46 = vld [vmem:[#allocation20_spill] sm:$0xff] }
  0x62   :  { %v371_v48 = vadd.f32 %v370_v27, %v369_v11  ;;  %v302_v42 = vsub.f32 %v1699_v10, %v1294_v36  ;;  %v332_v58 = vmul.f32 %v300_v30, %v300_v30  ;;  %v374_v34 = vsel %vm200_vm0, %v330_v38, 0.0  ;;  %v1702_v36 = vld [vmem:[#allocation21_spill] sm:$0xff] }
  0x63   :  { %v270_v2 = vmul.f32 -10.0, %v269_v33  ;;  %v552_v59 = vadd.f32 %v551_v17, %v550_v53  ;;  %v1700_v24 = vlaneseq  ;;  %v557_v52 = vsel %vm200_vm0, %v495_v31, 0.0  ;;  %v1706_v53 = vld [vmem:[#allocation25_spill] sm:$0xff] }
  0x64   :  { %v373_v7 = vadd.f32 %v372_v39, %v371_v48  ;;  %v303_v57 = vsub.f32 %v1701_v46, %v1299_v12  ;;  %v333_v50 = vmul.f32 %v301_v62, %v301_v62  ;;  %v376_v43 = vsel %vm200_vm0, %v331_v0, 0.0  ;;  %v1707_v0 = vld [vmem:[#allocation26_spill] sm:$0xff] }
  0x65   :  { %v271_v45 = vmul.f32 1.442695, %v270_v2  ;;  %v1499_v4 = vand.u32 127, %v1700_v24  ;;  %v554_v40 = vadd.f32 %v553_v16, %v552_v59  ;;  %v304_v32 = vsub.f32 %v1702_v36, %v1306_v14 }
  0x66   :  { %v375_v28 = vadd.f32 %v374_v34, %v373_v7  ;;  %v334_v3 = vmul.f32 %v302_v42, %v302_v42  ;;  %v378_v9 = vsel %vm200_vm0, %v332_v58, 0.0  ;;  %v305_v61 = vsub.f32 %v1703_v5, %v1311_v51  ;;  %v1705_v51 = vld [vmem:[#allocation24_spill] sm:$0xff] }
  0x67   :  { %690 = vpow2.f32 %v271_v45  ;;  %v556_v35 = vadd.f32 %v555_v25, %v554_v40  ;;  %vm37_vm1 = vcmp.lt.s32.totalorder %v1499_v4, 4  ;;  %v335_v12 = vmul.f32 %v303_v57, %v303_v57  ;;  %v1708_v25 = vld [vmem:[#allocation27_spill] sm:$0xff]  ;;  %v1709_v40 = vld [vmem:[#allocation28_spill] sm:$0xff] }
  0x68   :  { %v377_v8 = vadd.f32 %v376_v43, %v375_v28  ;;  %v380_v20 = vsel %vm200_vm0, %v333_v50, 0.0  ;;  %v306_v33 = vsub.f32 %v1704_v18, %v1323_v15  ;;  %v336_v19 = vmul.f32 %v304_v32, %v304_v32  ;;  %v1710_v50 = vld [vmem:[#allocation29_spill] sm:$0xff]  ;;  %v1711_v32 = vld [vmem:[#allocation31_spill] sm:$0xff] }
  0x69   :  { %v558_v21 = vadd.f32 %v557_v52, %v556_v35  ;;  %v382_v26 = vsel %vm200_vm0, %v334_v3, 0.0  ;;  %v307_v30 = vsub.f32 %v1705_v51, %v1330_v55  ;;  %v337_v38 = vmul.f32 %v305_v61, %v305_v61 }
  0x6a   :  { %v379_v49 = vadd.f32 %v378_v9, %v377_v8  ;;  %v384_v27 = vsel %vm200_vm0, %v335_v12, 0.0  ;;  %v308_v11 = vsub.f32 %v1706_v53, %v1340_v63  ;;  %v338_v15 = vmul.f32 %v306_v33, %v306_v33  ;;  %v1712_v8 = vld [vmem:[#allocation35_spill] sm:$0xff] }
  0x6b   :  { %v559_v6 = vrot.slane %v558_v21, 4  ;;  %v386_v16 = vsel %vm200_vm0, %v336_v19, 0.0  ;;  %v309_v39 = vsub.f32 %v1707_v0, %v1356_v22  ;;  %v339_v45 = vmul.f32 %v307_v30, %v307_v30 }
  0x6c   :  { %v381_v44 = vadd.f32 %v380_v20, %v379_v49  ;;  %v388_v59 = vsel %vm200_vm0, %v337_v38, 0.0  ;;  %v310_v10 = vsub.f32 %v1708_v25, %v1370_v41  ;;  %v340_v42 = vmul.f32 %v308_v11, %v308_v11  ;;  %v1713_v20 = vld [vmem:[#allocation40_spill] sm:$0xff] }
  0x6d   :  { %v691_v23 = vpop.eup %690  ;;  %v560_v17 = vadd.f32 %v559_v6, %v558_v21  ;;  %v390_v58 = vsel %vm200_vm0, %v338_v15, 0.0  ;;  %v311_v7 = vsub.f32 %v1709_v40, %v1380_v47  ;;  %v341_v52 = vmul.f32 %v309_v39, %v309_v39 }
  0x6e   :  { %v273_v14 = vsel %vm37_vm1, %v691_v23, 0.0  ;;  %v383_v31 = vadd.f32 %v382_v26, %v381_v44  ;;  %v392_v46 = vsel %vm200_vm0, %v339_v45, 0.0  ;;  %v312_v43 = vsub.f32 %v1710_v50, %v1390_v13 }
  0x6f   :  { %v275_v37 = vsel %vm274_vm2, %v273_v14, 0.0  ;;  %v561_v2 = vrot.slane %v560_v17, 2  ;;  %v342_v35 = vmul.f32 %v310_v10, %v310_v10  ;;  %v394_v28 = vsel %vm200_vm0, %v340_v42, 0.0 }
  0x70   :  { %276 = vadd.xlane.f32.xlu0 %v275_v37  ;;  %v385_v62 = vadd.f32 %v384_v27, %v383_v31  ;;  %v313_v3 = vsub.f32 %v1711_v32, %v1409_v1  ;;  %v343_v9 = vmul.f32 %v311_v7, %v311_v7  ;;  %v396_v21 = vsel %vm200_vm0, %v341_v52, 0.0  ;;  %v1714_v1 = vld [vmem:[#allocation41_spill] sm:$0xff] }
  0x71   :  { %v562_v60 = vadd.f32 %v561_v2, %v560_v17  ;;  %v314_v5 = vsub.f32 %v1712_v8, %v1431_v29  ;;  %v344_v61 = vmul.f32 %v312_v43, %v312_v43  ;;  %v398_v12 = vsel %vm200_vm0, %v342_v35, 0.0 }
  0x72   :  { %v387_v48 = vadd.f32 %v386_v16, %v385_v62  ;;  %v315_v23 = vsub.f32 %v1713_v20, %v1445_v56  ;;  %v345_v6 = vmul.f32 %v313_v3, %v313_v3  ;;  %v400_v49 = vsel %vm200_vm0, %v343_v9, 0.0 }
  0x73   :  { %v563_v55 = vrot.slane %v562_v60, 1  ;;  %v316_v18 = vsub.f32 %v1714_v1, %v1460_v54  ;;  %v346_v33 = vmul.f32 %v314_v5, %v314_v5  ;;  %v402_v19 = vsel %vm200_vm0, %v344_v61, 0.0 }
  0x74   :  { %v389_v34 = vadd.f32 %v388_v59, %v387_v48  ;;  %v347_v17 = vmul.f32 %v315_v23, %v315_v23  ;;  %v404_v44 = vsel %vm200_vm0, %v345_v6, 0.0  ;;  %v580_v8 = vshrl.u32 %v1700_v24, 7 }
  0x75   :  { %v564_v63 = vadd.f32 %v563_v55, %v562_v60  ;;  %v348_v30 = vmul.f32 %v316_v18, %v316_v18  ;;  %v406_v38 = vsel %vm200_vm0, %v346_v33, 0.0  ;;  %vm582_vm5 = vcmp.eq.s32.totalorder %v1499_v4, 1 }
  0x76   :  { %v391_v57 = vadd.f32 %v390_v58, %v389_v34  ;;  %v408_v54 = vsel %vm200_vm0, %v347_v17, 0.0  ;;  %vm581_vm4 = vcmp.eq.s32.totalorder %v580_v8, 0  ;;  %vm584_vm6 = vcmp.eq.s32.totalorder %v580_v8, 1 }
  0x77   :  { %v565_v22 = vmul.f32 -10.0, %v564_v63  ;;  %v410_v31 = vsel %vm200_vm0, %v348_v30, 0.0  ;;  %vm585_vm7 = vcmp.eq.s32.totalorder %v1499_v4, 0  ;;  %vm1565_vm8 = vmand %vm581_vm4, %vm582_vm5  ;;  %vm591_vm10 = vcmp.eq.s32.totalorder %v1499_v4, 2 }
  0x78   :  { %v393_v36 = vadd.f32 %v392_v46, %v391_v57  ;;  %vm1569_vm9 = vmand %vm584_vm6, %vm585_vm7  ;;  %vm593_vm11 = vcmp.eq.s32.totalorder %v580_v8, 2 }
  0x79   :  { %v566_v41 = vmul.f32 1.442695, %v565_v22  ;;  %vm587_vm12 = vmor %vm1565_vm8, %vm1569_vm9 }
  0x7a   :  { %v395_v47 = vadd.f32 %v394_v28, %v393_v36  ;;  %vm592_vm13 = vmand %vm581_vm4, %vm591_vm10 }
  0x7b   :  { %692 = vpow2.f32 %v566_v41  ;;  %vm594_vm14 = vmand %vm593_vm11, %vm585_vm7 }
  0x7c   :  { %v397_v13 = vadd.f32 %v396_v21, %v395_v47  ;;  %v696_v47 = vmov 0.0   ;;  %vm599_vm15 = vmand %vm584_vm6, %vm591_vm10 }
  0x7d   :  { %30 = vst.msk [vmem:[%s1586_s1] sm:$0x7] %vm29_vm3, %v696_v47  ;;  %vm600_vm0 = vmand %vm593_vm11, %vm582_vm5 }
  0x7e   :  { %v399_v14 = vadd.f32 %v398_v12, %v397_v13 }
  0x80   :  { %v401_v37 = vadd.f32 %v400_v49, %v399_v14 }
  0x81   :  { %v693_v26 = vpop.eup %692 }
  0x82   :  { %v568_v29 = vsel %vm37_vm1, %v693_v26, 0.0  ;;  %v403_v51 = vadd.f32 %v402_v19, %v401_v37 }
  0x83   :  { %v569_v56 = vsel %vm274_vm2, %v568_v29, 0.0 }
  0x84   :  { %570 = vadd.xlane.f32.xlu1 %v569_v56  ;;  %v405_v27 = vadd.f32 %v404_v44, %v403_v51  ;;  %v605_v49 = vld [vmem:[%s1586_s1] sm:$0x7] }
  0x86   :  { %v407_v2 = vadd.f32 %v406_v38, %v405_v27 }
  0x88   :  { %v409_v53 = vadd.f32 %v408_v54, %v407_v2 }
  0x8a   :  { %v411_v11 = vadd.f32 %v410_v31, %v409_v53 }
  0x8c   :  { %v412_v15 = vrot.slane %v411_v11, 4 }
  0x8e   :  { %v413_v16 = vadd.f32 %v412_v15, %v411_v11 }
  0x90   :  { %v414_v60 = vrot.slane %v413_v16, 2 }
  0x92   :  { %v415_v62 = vadd.f32 %v414_v60, %v413_v16 }
  0x94   :  { %v416_v0 = vrot.slane %v415_v62, 1 }
  0x96   :  { %v417_v39 = vadd.f32 %v416_v0, %v415_v62 }
  0x98   :  { %v418_v45 = vmul.f32 -10.0, %v417_v39 }
  0x9a   :  { %v419_v59 = vmul.f32 1.442695, %v418_v45 }
  0x9c   :  { %694 = vpow2.f32 %v419_v59 }
  0xa2   :  { %v695_v55 = vpop.eup %694 }
  0xa3   :  { %v421_v48 = vsel %vm37_vm1, %v695_v55, 0.0  ;;  %vm595_vm1 = vmor %vm592_vm13, %vm594_vm14 }
  0xa4   :  { %v422_v25 = vsel %vm274_vm2, %v421_v48, 0.0  ;;  %vm601_vm2 = vmor %vm599_vm15, %vm600_vm0 }
  0xa5   :  { %423 = vadd.xlane.f32.xlu0 %v422_v25 }
  0xe3   :  { %v277_v10 = vpop.xlane.xlu0 %276 }
  0xe4   :  { %v278_v42 = vrot.slane %v277_v10, 4 }
  0xe6   :  { %v279_v58 = vadd.f32 %v278_v42, %v277_v10 }
  0xe8   :  { %v280_v63 = vrot.slane %v279_v58, 2 }
  0xea   :  { %v281_v34 = vadd.f32 %v280_v63, %v279_v58 }
  0xec   :  { %v282_v40 = vrot.slane %v281_v34, 1 }
  0xee   :  { %v283_v7 = vadd.f32 %v282_v40, %v281_v34 }
  0xf0   :  { %683 = vpush %v283_v7 }
  0xf7   :  { %v571_v52 = vpop.xlane.xlu1 %570 }
  0xf8   :  { %v572_v46 = vrot.slane %v571_v52, 4 }
  0xfa   :  { %v573_v22 = vadd.f32 %v572_v46, %v571_v52 }
  0xfc   :  { %v574_v57 = vrot.slane %v573_v22, 2 }
  0xfe   :  { %v575_v28 = vadd.f32 %v574_v57, %v573_v22 }
 0x100   :  { %v576_v32 = vrot.slane %v575_v28, 1 }
 0x102   :  { %v577_v21 = vadd.f32 %v576_v32, %v575_v28 }
 0x118   :  { %v424_v50 = vpop.xlane.xlu0 %423 }
 0x119   :  { %v425_v43 = vrot.slane %v424_v50, 4 }
 0x11b   :  { %v426_v35 = vadd.f32 %v425_v43, %v424_v50 }
 0x11d   :  { %v427_v41 = vrot.slane %v426_v35, 2 }
 0x11f   :  { %v428_v36 = vadd.f32 %v427_v41, %v426_v35 }
 0x121   :  { %v429_v3 = vrot.slane %v428_v36, 1  ;;  %s684_s25 = spop %683 }
 0x122   :  { %v588_v24 = vstv %s684_s25 }
 0x123   :  { %v430_v9 = vadd.f32 %v429_v3, %v428_v36  ;;  %v589_v13 = vsel %vm587_vm12, %v588_v24, 0.0 }
 0x125   :  { %685 = vpush %v430_v9 }
 0x126   :  { %687 = vpush %v577_v21 }
 0x156   :  { %s686_s26 = spop %685 }
 0x157   :  { %v596_v12 = vstv %s686_s26  ;;  %s688_s27 = spop %687 }
 0x158   :  { %v597_v20 = vsel %vm595_vm1, %v596_v12, 0.0  ;;  %v602_v4 = vstv %s688_s27 }
 0x159   :  { %v598_v23 = vadd.f32 %v597_v20, %v589_v13  ;;  %v603_v6 = vsel %vm601_vm2, %v602_v4, 0.0 }
 0x15b   :  { %v604_v14 = vadd.f32 %v603_v6, %v598_v23 }
 0x15d   :  { %v606_v1 = vadd.f32 %v605_v49, %v604_v14 }
 0x15f   :  { %608 = vst.msk [vmem:[%s1586_s1] sm:$0x7] %vm29_vm3, %v606_v1 }

</bundles_post_ra>
